<compile_context>
chip_gen: v7x
topology: tpu7x:2x2x1
jax: 0.10.0
libtpu: 0.0.40
codegen_flags: <defaults>
</compile_context>

<pallas_src>
import jax
import jax.numpy as jnp
from jax import lax
from jax.experimental import pallas as pl
from jax.experimental.pallas import tpu as pltpu

FC2_IN = 512     # fc2 = nn.Linear(512, 1024) is hard-coded in the module
FC2_OUT = 1024


# ---------------------------------------------------------------------------
# fc2 + ReLU:  h = relu(x @ W2t + b2)
# grid = (N // tn,); full-K block, no reduction axis, no accumulator.
# ---------------------------------------------------------------------------
def _fc2_relu_kernel(x_ref, w_ref, b_ref, o_ref):
    y = jnp.dot(x_ref[...], w_ref[...], preferred_element_type=jnp.float32)
    o_ref[...] = jnp.maximum(y + b_ref[...], 0.0).astype(o_ref.dtype)


def pallas_fc2_relu(x, wt, b, *, tn=512):
    """x: (M, K) f32, wt: (K, N) f32 (pre-transposed), b: (N,) f32 -> (M, N)."""
    M, K = x.shape
    Kw, N = wt.shape
    assert Kw == K
    tn = min(tn, N)
    assert N % tn == 0
    b_full = jnp.broadcast_to(b[None, :], (M, N))  # lane/sublane-dense bias block

    return pl.pallas_call(
        _fc2_relu_kernel,
        out_shape=jax.ShapeDtypeStruct((M, N), x.dtype),
        grid_spec=pltpu.PrefetchScalarGridSpec(
            num_scalar_prefetch=0,
            grid=(N // tn,),
            in_specs=[
                pl.BlockSpec((M, K), lambda j: (0, 0)),   # activation stays resident
                pl.BlockSpec((K, tn), lambda j: (0, j)),  # weight streamed over N
                pl.BlockSpec((M, tn), lambda j: (0, j)),  # bias
            ],
            out_specs=pl.BlockSpec((M, tn), lambda j: (0, j)),
        ),
        compiler_params=pltpu.CompilerParams(
            dimension_semantics=("parallel",),            # sharded across TCs on v7x
        ),
    )(x, wt, b_full)


# ---------------------------------------------------------------------------
# Fused decoder head: fc3_fractions + min-max scaling + sum normalization +
# reconstruction matmul against signature_matrix.T — a single pallas_call.
# Everything fits comfortably in VMEM at these sizes.
# ---------------------------------------------------------------------------
def _decoder_head_kernel(h_ref, w3_ref, b3_ref, sig_ref, cf_ref, recon_ref):
    # cell fractions (raw logits)
    cf = jnp.dot(h_ref[...], w3_ref[...], preferred_element_type=jnp.float32)
    cf = cf + b3_ref[...]
    # row-wise min-max scaling
    mn = jnp.min(cf, axis=-1, keepdims=True)
    mx = jnp.max(cf, axis=-1, keepdims=True)
    cf = (cf - mn) / (mx - mn + 1e-6)
    # row-wise sum normalization
    cf = cf / jnp.sum(cf, axis=-1, keepdims=True)
    cf_ref[...] = cf.astype(cf_ref.dtype)
    # reconstructed pseudobulk = cf @ signature_matrix.T
    # (contract last dims of both -> no transpose materialized)
    recon_ref[...] = lax.dot_general(
        cf, sig_ref[...].astype(jnp.float32),
        dimension_numbers=(((1,), (1,)), ((), ())),
        preferred_element_type=jnp.float32,
    ).astype(recon_ref.dtype)


def pallas_decoder_head(h, w3t, b3, signature_matrix):
    """h: (M, K), w3t: (K, C), b3: (C,), signature_matrix: (G, C) -> ((M, C), (M, G))."""
    M, K = h.shape
    Kw, C = w3t.shape
    G, Cs = signature_matrix.shape
    assert Kw == K and Cs == C
    b3_full = jnp.broadcast_to(b3[None, :], (M, C))

    return pl.pallas_call(
        _decoder_head_kernel,
        out_shape=(
            jax.ShapeDtypeStruct((M, C), h.dtype),   # cell_fractions
            jax.ShapeDtypeStruct((M, G), h.dtype),   # reconstructed_pseudobulk
        ),
    )(h, w3t, b3_full, signature_matrix)


# ---------------------------------------------------------------------------
# Decoder forward built from the Pallas kernels.
# ---------------------------------------------------------------------------
def decoder_forward(params, x):
    h = pallas_fc2_relu(x, params["w2t"], params["b2"])
    cf, recon = pallas_decoder_head(
        h, params["w3t"], params["b3"], params["signature_matrix"]
    )
    # gep_matrix is a plain parameter returned unchanged (no compute needed).
    return cf, recon, params["gep_matrix"]


def decoder_reference(params, x):
    with jax.default_matmul_precision("float32"):
        h = jax.nn.relu(x @ params["w2t"] + params["b2"])
        cf = h @ params["w3t"] + params["b3"]
        mn = jnp.min(cf, axis=-1, keepdims=True)
        mx = jnp.max(cf, axis=-1, keepdims=True)
        cf = (cf - mn) / (mx - mn + 1e-6)
        cf = cf / jnp.sum(cf, axis=-1, keepdims=True)
        recon = cf @ params["signature_matrix"].T
        return cf, recon, params["gep_matrix"]


if __name__ == "__main__":
    batch = 8
    input_dim = 256    # genes: rows of signature_matrix / gep_matrix
    hidden_dim = 64    # unused by Decoder.forward (kept only for ctor parity)
    output_dim = 128   # cell types

    key = jax.random.PRNGKey(0)
    ks = jax.random.split(key, 8)
    scale = 0.02

    x = jax.random.normal(ks[0], (batch, FC2_IN), jnp.float32)
    params = dict(
        # Linear weights pre-transposed to (in_features, out_features).
        w2t=jax.random.normal(ks[1], (FC2_IN, FC2_OUT), jnp.float32) * scale,
        b2=jax.random.normal(ks[2], (FC2_OUT,), jnp.float32) * scale,
        w3t=jax.random.normal(ks[3], (FC2_OUT, output_dim), jnp.float32) * scale,
        b3=jax.random.normal(ks[4], (output_dim,), jnp.float32) * scale,
        gep_matrix=jax.random.normal(ks[5], (input_dim, output_dim), jnp.float32),
        signature_matrix=jax.random.normal(ks[6], (input_dim, output_dim), jnp.float32),
    )

    cf, recon, gep = decoder_forward(params, x)
    (cf, recon, gep) = jax.block_until_ready((cf, recon, gep))

    cf_ref, recon_ref, gep_ref = decoder_reference(params, x)
    cf_ref, recon_ref = jax.block_until_ready((cf_ref, recon_ref))

    assert cf.shape == (batch, output_dim)
    assert recon.shape == (batch, input_dim)
    assert gep.shape == (input_dim, output_dim)
    assert jnp.allclose(cf, cf_ref, rtol=1e-3, atol=1e-3), (
        float(jnp.max(jnp.abs(cf - cf_ref))))
    assert jnp.allclose(recon, recon_ref, rtol=1e-3, atol=1e-3), (
        float(jnp.max(jnp.abs(recon - recon_ref))))
    assert jnp.array_equal(gep, gep_ref)
    print("KERNEL_OK")
</pallas_src>

<mosaic_0001>
module attributes {stable_mosaic.version = 11 : i64} {
  func.func @_fc2_relu_kernel(%arg0: i32, %arg1: memref<8x512xf32, #tpu.memory_space<vmem>>, %arg2: memref<512x512xf32, #tpu.memory_space<vmem>>, %arg3: memref<8x512xf32, #tpu.memory_space<vmem>>, %arg4: memref<8x512xf32, #tpu.memory_space<vmem>>) attributes {dimension_semantics = [#tpu.dimension_semantics<parallel>], iteration_bounds = array<i64: 2>, scalar_prefetch = 0 : i64, scratch_operands = 0 : i64, tpu.core_type = #tpu.core_type<tc>, window_params = [{pipeline_mode = #tpu.pipeline_mode<synchronous>, transform_indices = @transform_0, window_bounds = array<i64: 8, 512>}, {transform_indices = @transform_1, window_bounds = array<i64: 512, 512>}, {transform_indices = @transform_2, window_bounds = array<i64: 8, 512>}, {transform_indices = @transform_3, window_bounds = array<i64: 8, 512>}]} {
    %c0 = arith.constant 0 : index
    %c0_0 = arith.constant 0 : index
    %0 = vector.load %arg1[%c0, %c0_0] : memref<8x512xf32, #tpu.memory_space<vmem>>, vector<8x512xf32>
    %c0_1 = arith.constant 0 : index
    %c0_2 = arith.constant 0 : index
    %1 = vector.load %arg2[%c0_1, %c0_2] : memref<512x512xf32, #tpu.memory_space<vmem>>, vector<512x512xf32>
    %cst = arith.constant dense<0.000000e+00> : vector<8x512xf32>
    %2 = tpu.matmul %0, %1, %cst {dimension_numbers = #tpu.dot_dimension_numbers<[1], [0], [0], [1], [0, 0, 1, 1], [], []>} : vector<8x512xf32>, vector<512x512xf32>, vector<8x512xf32> -> vector<8x512xf32>
    %c0_3 = arith.constant 0 : index
    %c0_4 = arith.constant 0 : index
    %3 = vector.load %arg3[%c0_3, %c0_4] : memref<8x512xf32, #tpu.memory_space<vmem>>, vector<8x512xf32>
    %4 = arith.addf %2, %3 : vector<8x512xf32>
    %cst_5 = arith.constant 0.000000e+00 : f32
    %5 = vector.broadcast %cst_5 : f32 to vector<8x512xf32>
    %6 = arith.maximumf %4, %5 : vector<8x512xf32>
    %c0_6 = arith.constant 0 : index
    %c0_7 = arith.constant 0 : index
    %7 = vector.load %arg4[%c0_6, %c0_7] : memref<8x512xf32, #tpu.memory_space<vmem>>, vector<8x512xf32>
    tpu.vector_store %arg4[%c0_6, %c0_7], %6 {strides = array<i32>} : memref<8x512xf32, #tpu.memory_space<vmem>>, vector<8x512xf32>,
    return
  }
  func.func @transform_0(%arg0: i32) -> (i32, i32) {
    %c0_i32 = arith.constant 0 : i32
    %c0_i32_0 = arith.constant 0 : i32
    %c0_i32_1 = arith.constant 0 : i32
    return %c0_i32, %c0_i32_0 : i32, i32
  }
  func.func @transform_1(%arg0: i32) -> (i32, i32) {
    %c0_i32 = arith.constant 0 : i32
    %c0_i32_0 = arith.constant 0 : i32
    return %c0_i32, %arg0 : i32, i32
  }
  func.func @transform_2(%arg0: i32) -> (i32, i32) {
    %c0_i32 = arith.constant 0 : i32
    %c0_i32_0 = arith.constant 0 : i32
    return %c0_i32, %arg0 : i32, i32
  }
  func.func @transform_3(%arg0: i32) -> (i32, i32) {
    %c0_i32 = arith.constant 0 : i32
    %c0_i32_0 = arith.constant 0 : i32
    return %c0_i32, %arg0 : i32, i32
  }
}

</mosaic_0001>

<bundles_post_ra>
// kernel: tpu_custom_call.1
= control target key start
LH: loop header
LB: loop body
LE: loop exit
PB: predicated region body
PF: predicated region fallthrough
CT: control target
= control target key end

     0   :  { %8 = vsyncpa [#allocation3], 0  ;;  %s1948_s0 = inlined_call_operand.hbm [shape: f32[8,512], index: 0, kind: input, shape index: {}]   ;;  %s1949_s1 = inlined_call_operand.hbm [shape: f32[512,1024], index: 1, kind: input, shape index: {}]   ;;  %s1950_s2 = inlined_call_operand.hbm [shape: f32[8,1024], index: 2, kind: input, shape index: {}]   ;;  %s1951_s3 = inlined_call_operand.hbm [shape: f32[8,1024], index: 3, kind: output, shape index: {}]  }
   0x1   :  { %9 = vsyncpa [#allocation6], 0 }
   0x2   :  { %11 = vsyncpa [#allocation6 + $0x1], 0 }
   0x3   :  { %12 = vsyncpa [#allocation4], 0 }
   0x4   :  { %14 = vsyncpa [#allocation4 + $0x1], 0  ;;  %s1452_s12 = smov 0   ;;  %s1454_s13 = smov 0  }
   0x5   :  { %s1456_s14 = smov 0   ;;  %s1458_s15 = smov 0  }
   0x6 LB: > { %s1473_s16 = sadd.s32 1, %s1423_s15   ;;  %s48_s17 = sadd.s32 1, %s1419_s14  ;;  %s1423_s15 = sphi %s1458_s15, %s1974_s15   ;;  %s1419_s14 = sphi %s1456_s14, %s1973_s14   ;;  %s1415_s13 = sphi %s1454_s13, %s1972_s13   ;;  %s1411_s12 = sphi %s1452_s12, %s1971_s12  }
   0x7   : > { %s45_s18 = ssub.s32 %s1423_s15, %s1473_s16  ;;  %p55_p0 = scmp.ne.s32.totalorder %s1419_s14, %s1415_s13 }
   0x8   : > { %p46_p1 = scmp.eq.s32.totalorder %s45_s18, 0  ;;  %p56_p2 = scmp.eq.s32.totalorder %s1423_s15, 0 }
   0x9   : > { %p1226_p4 = scmp.lt.s32.totalorder %s1423_s15, 2  ;;  %s148_s20 = sand.u32 1, %s1423_s15  }
   0xa   : > { %s1484_s19 = scalar_select %p46_p1, %s1419_s14, %s48_s17  }
   0xb   : > { %p57_p5 = por %p56_p2, %p55_p0  ;;  %s150_s21 = sand.u32 1, %s1419_s14  }
   0xc   : > { %s917_s22 = sshll.u32 %s150_s21, 11  ;;  %s933_s23 = sshll.u32 %s1423_s15, 9 }
   0xd   : > { %s1499_s26 = scalar_lea.hbm %s1949_s1, %s933_s23  ;;  %s152_s27 = scalar_lea.vmem [#allocation5], %s917_s22 }
   0xe   : > { %s159_s28 = sshll.u32 %s152_s27, 4  ;;  %p1501_p6 = pnand %p1226_p4, %p57_p5  ;;  %s1505_s28 = int_to_ptr.vmem [resolvable:$true] %s159_s28 }
   0xf   : > { %s1507_s30 = scalar_lea.sflag [#allocation6], %s148_s20  ;;  %s1265_s4 = scalar_lea.hbm %s1499_s26, 32768 }
  0x10   : > { %p1266_p7 = scmp.ne.s32.totalorder %s1499_s26, %s1265_s4  ;;  %p1267_p8 = pneg %p1501_p6 }
  0x11   : > { %s1270_s7 = scalar_lea.hbm %s1949_s1, 65536  ;;  %p1271_p11 = scmp.lt.u32.totalorder %s1499_s26, %s1949_s1 }
  0x12   : > { %p1268_p9 = pnand %p1267_p8, %p1266_p7  ;;  %p1272_p12 = scmp.lt.u32.totalorder %s1270_s7, %s1265_s4 }
  0x13   : > { %p1274_p1 = scmp.lt.u32.totalorder %s1265_s4, %s1499_s26 }
  0x14   : > { %p1269_p10 = pneg %p1268_p9  ;;  %p1273_p13 = por %p1272_p12, %p1271_p11 }
  0x16   : > { %p1275_p2 = por %p1274_p1, %p1273_p13 }
  0x18   : > { %p1276_p4 = pnand %p1275_p2, %p1269_p10 }
  0x1a   : > { %1279 = shalt.err (!%p1276_p4)
}
  0x1b   : > { %s1280_s10 = scalar_lea.vmem %s1505_s28, 32768  ;;  %s1425_s11 = smov [#allocation5]  }
  0x1c   : > { %p1281_p5 = scmp.ne.s32.totalorder %s1505_s28, %s1280_s10  ;;  %s1285_s17 = sshll.u32 %s1425_s11, 4  ;;  %s1286_s17 = int_to_ptr.vmem [resolvable:$false] %s1285_s17 }
  0x1d   : > { %s1287_s18 = scalar_lea.vmem %s1286_s17, 65536  ;;  %p1288_p3 = scmp.lt.s32.totalorder %s1505_s28, %s1286_s17 }
  0x1e   : > { %p1283_p7 = pnand %p1281_p5, %p1267_p8  ;;  %p1289_p11 = scmp.lt.s32.totalorder %s1287_s18, %s1280_s10 }
  0x20   : > { %p1284_p9 = pneg %p1283_p7  ;;  %p1290_p12 = por %p1289_p11, %p1288_p3 }
  0x22   : > { %p1291_p13 = pnand %p1290_p12, %p1284_p9 }
  0x24   : > { %1294 = shalt.err (!%p1291_p13)
}
  0x25   : > { %s1426_s20 = smov 1024   ;;  %s1427_s22 = smov 512  }
  0x26   : > { %s1428_s24 = smov 32   ;;  %s1536_s25 = sadd.s32 4294967295, %s1423_s15  }
  0x27   : > { %1217 = dma.hbm_to_vmem [thread:$0]  (!%p1501_p6), %s1499_s26, 32768, %s1505_s28, %s1507_s30, %s1426_s20, %s1427_s22, %s1428_s24  }
  0x28   : > { %s913_s27 = sadd.s32 4294967294, %s1423_s15   ;;  %p61_p3 = scmp.ne.s32.totalorder %s1415_s13, %s1411_s12 }
  0x29   : > { %p1952_p10 = scmp.eq.s32.totalorder %s1536_s25, 0  ;;  %p111_p1 = scmp.eq.s32.totalorder %s1536_s25, 1 }
  0x2a   : > { %p117_p2 = scmp.eq.s32.totalorder %s913_s27, 1  ;;  %p914_p4 = scmp.ge.s32.totalorder %s1423_s15, 1 }
  0x2b   : > { %p1546_p5 = por %p1952_p10, %p61_p3  ;;  %p1553_p7 = por %p111_p1, %p55_p0 }
  0x2c   : > { %p1557_p9 = por %p117_p2, %p61_p3  ;;  %p124_p11 = scmp.lt.s32.totalorder %s1423_s15, 3 }
  0x2d   : > { %s1958_s4 = scalar_select %p1546_p5, 1, 0 }
  0x2e   : > { %s1959_s26 = scalar_select %p1553_p7, 1, 0 }
  0x2f   : > { %s1960_s28 = scalar_select %p1557_p9, 1, 0 }
  0x30   : > { %p1562_p12 = pnand %p914_p4, %p124_p11  ;;  %s1429_s6 = smov [#allocation2]  }
  0x31   : > { %s137_s7 = sshll.u32 %s1429_s6, 4  ;;  %s920_s8 = sshll.u32 %s150_s21, 5  ;;  %s1566_s7 = int_to_ptr.vmem [resolvable:$true] %s137_s7 }
  0x32   : > { %s1961_s5 = scalar_select %p1562_p12, 1, 0 }
  0x33   : > { %p1210_p0 = pneg %p1562_p12  ;;  %s1577_s11 = scalar_lea.hbm %s1950_s2, %s933_s23 }
  0x34   : > { %s173_s17 = scalar_lea.vmem [#allocation7], %s920_s8  ;;  %s1295_s21 = scalar_lea.hbm %s1577_s11, 512 }
  0x35   : > { %s181_s18 = sshll.u32 %s173_s17, 4  ;;  %p1581_p13 = pnand %p1210_p0, %p1952_p10  ;;  %s182_s18 = int_to_ptr.vmem [resolvable:$true] %s181_s18 }
  0x36   : > { %p1296_p3 = scmp.ne.s32.totalorder %s1577_s11, %s1295_s21  ;;  %s1300_s24 = scalar_lea.hbm %s1950_s2, 1024 }
  0x37   : > { %s1962_s20 = scalar_select %p1581_p13, 1, 0 }
  0x38   : > { %p1298_p1 = pnand %p1296_p3, %p1267_p8  ;;  %p1301_p4 = scmp.lt.u32.totalorder %s1577_s11, %s1950_s2 }
  0x39   : > { %p1302_p11 = scmp.lt.u32.totalorder %s1300_s24, %s1295_s21  ;;  %p1304_p10 = scmp.lt.u32.totalorder %s1295_s21, %s1577_s11 }
  0x3a   : > { %p1299_p2 = pneg %p1298_p1 }
  0x3b   : > { %p1303_p0 = por %p1302_p11, %p1301_p4 }
  0x3d   : > { %p1305_p9 = por %p1304_p10, %p1303_p0 }
  0x3f   : > { %p1306_p7 = pnand %p1305_p9, %p1299_p2 }
  0x41   : > { %1309 = shalt.err (!%p1306_p7)
}
  0x42   : > { %s1310_s8 = scalar_lea.vmem %s182_s18, 512  ;;  %s1430_s9 = smov [#allocation7]  }
  0x43   : > { %p1311_p5 = scmp.ne.s32.totalorder %s182_s18, %s1310_s8  ;;  %s1315_s10 = sshll.u32 %s1430_s9, 4  ;;  %s1316_s10 = int_to_ptr.vmem [resolvable:$false] %s1315_s10 }
  0x44   : > { %s1317_s17 = scalar_lea.vmem %s1316_s10, 1024  ;;  %p1318_p12 = scmp.lt.s32.totalorder %s182_s18, %s1316_s10 }
  0x45   : > { %p1313_p3 = pnand %p1311_p5, %p1267_p8  ;;  %p1319_p13 = scmp.lt.s32.totalorder %s1317_s17, %s1310_s8 }
  0x47   : > { %p1314_p1 = pneg %p1313_p3  ;;  %p1320_p4 = por %p1319_p13, %p1318_p12 }
  0x49   : > { %p1321_p11 = pnand %p1320_p4, %p1314_p1 }
  0x4b   : > { %1324 = shalt.err (!%p1321_p11)
}
  0x4c   : > { %1220 = dma.hbm_to_vmem [thread:$0]  (!%p1501_p6), %s1577_s11, 512, %s182_s18, %s1507_s30  }
  0x4d   : > { %s1325_s22 = scalar_lea.hbm %s1948_s0, 512  ;;  %p1963_p10 = scmp.ne.s32.totalorder %s1962_s20, 0 }
  0x4e   : > { %p1326_p8 = scmp.ne.s32.totalorder %s1948_s0, %s1325_s22  ;;  %p1332_p12 = scmp.lt.u32.totalorder %s1325_s22, %s1948_s0 }
  0x4f   : > { %p1327_p5 = pneg %p1963_p10 }
  0x51   : > { %p1328_p7 = pnand %p1327_p5, %p1326_p8 }
  0x53   : > { %p1329_p9 = pneg %p1328_p7 }
  0x55   : > { %p1334_p13 = pnand %p1332_p12, %p1329_p9 }
  0x57   : > { %1337 = shalt.err (!%p1334_p13)
}
  0x58   : > { %s1338_s29 = scalar_lea.vmem %s1566_s7, 512  ;;  %p1346_p3 = scmp.lt.s32.totalorder %s1566_s7, %s1566_s7 }
  0x59   : > { %p1339_p6 = scmp.ne.s32.totalorder %s1566_s7, %s1338_s29  ;;  %p1347_p1 = scmp.lt.s32.totalorder %s1338_s29, %s1338_s29 }
  0x5b   : > { %p1341_p2 = pnand %p1339_p6, %p1327_p5  ;;  %p1348_p4 = por %p1347_p1, %p1346_p3 }
  0x5d   : > { %p1342_p0 = pneg %p1341_p2 }
  0x5f   : > { %p1349_p11 = pnand %p1348_p4, %p1342_p0 }
  0x61   : > { %1352 = shalt.err (!%p1349_p11)
}
  0x62   : > { %1213 = dma.hbm_to_vmem [thread:$0]  (!%p1963_p10), %s1948_s0, 512, %s1566_s7, [#allocation3]  }
  0x63   : > { %p1964_p8 = scmp.ne.s32.totalorder %s1961_s5, 0 }
  0x64   : > { %p1965_p7 = scmp.eq.s32.totalorder (!%p1964_p8), %s1536_s25, 0 }
  0x65   : > { %190 = sbr.rel (%p1964_p8) target bundleno = 478 (0x1de), region = 32 }
  0x6c   : > { %1398 = dma.done.wait (%p1965_p7), [#allocation3], 512   ;;  %p1966_p5 = pmov %p1965_p7 }
  0x6d   : > { %s196_s18 = sand.u32 1, %s1536_s25   ;;  %s1634_s9 = sand.u32 1, %s1415_s13  }
  0x6e   : > { %1400 = vsyncadd (%p1966_p5), [#allocation3], 4294966784  ;;  %s925_s20 = sshll.u32 %s1634_s9, 11  ;;  %s197_s10 = scalar_lea.sflag [#allocation6], %s196_s18 }
  0x6f   : > { %s1637_s17 = scalar_lea.vmem [#allocation5], %s925_s20  ;;  %p1967_p10 = scmp.ne.s32.totalorder %s1958_s4, 0 }
  0x71   : > { %1402 = dma.done.wait (%p1967_p10), %s197_s10, 33280  }
  0x72   : > { %1404 = vsyncadd (%p1967_p10), %s197_s10, 4294934016  ;;  %v245_v0 = vld [vmem:[%s1637_s17 + $0x8] sm:$0xff]  ;;  %v247_v2 = vld [vmem:[%s1637_s17 + $0x18] sm:$0xff]  ;;  %s926_s4 = sshll.u32 %s1634_s9, 5  ;;  %s935_s23 = sshll.u32 %s1536_s25, 9 }
  0x73   : > { %v249_v1 = vld [vmem:[%s1637_s17 + $0x28] sm:$0xff]  ;;  %v251_v4 = vld [vmem:[%s1637_s17 + $0x38] sm:$0xff]  ;;  %v244_v5 = vld [vmem:[%s1637_s17] sm:$0xff]  ;;  %s209_s5 = scalar_lea.vmem [#allocation7], %s926_s4  ;;  %s236_s7 = scalar_lea.vmem [#allocation8], %s926_s4 }
  0x74   : > { %v936_v3 = vpack.c.bf16 %v249_v1, %v245_v0  ;;  %v248_v6 = vld [vmem:[%s1637_s17 + $0x20] sm:$0xff]  ;;  %v1064_v7 = vpack.c.bf16 %v251_v4, %v247_v2  ;;  %v246_v9 = vld [vmem:[%s1637_s17 + $0x10] sm:$0xff]  ;;  %v253_v11 = vld [vmem:[%s1637_s17 + $0x48] sm:$0xff]  ;;  %s811_s21 = sshll.u32 %s236_s7, 4  ;;  %s1906_s27 = scalar_lea.hbm %s1951_s3, %s935_s23  ;;  %s1901_s21 = int_to_ptr.vmem [resolvable:$true] %s811_s21 }
  0x75   : > { %v938_v8 = vpack.c.bf16 %v248_v6, %v244_v5  ;;  %v250_v10 = vld [vmem:[%s1637_s17 + $0x30] sm:$0xff]  ;;  %v257_v13 = vld [vmem:[%s1637_s17 + $0x68] sm:$0xff]  ;;  %v255_v14 = vld [vmem:[%s1637_s17 + $0x58] sm:$0xff]  ;;  %s797_s25 = scalar_lea.sflag [#allocation4], %s1634_s9  ;;  %s1353_s6 = scalar_lea.vmem %s1901_s21, 512 }
  0x76   : > { %937 = vmatprep.subr.bf16.mxu0 %v936_v3  ;;  %v1066_v12 = vpack.c.bf16 %v250_v10, %v246_v9  ;;  %v259_v15 = vld [vmem:[%s1637_s17 + $0x78] sm:$0xff]  ;;  %1065 = vmatprep.subr.bf16.mxu1 %v1064_v7  ;;  %v940_v16 = vpack.c.bf16 %v257_v13, %v253_v11  ;;  %v252_v18 = vld [vmem:[%s1637_s17 + $0x40] sm:$0xff]  ;;  %v254_v20 = vld [vmem:[%s1637_s17 + $0x50] sm:$0xff]  ;;  %p1354_p9 = scmp.ne.s32.totalorder %s1901_s21, %s1353_s6  ;;  %p1968_p12 = scmp.ne.s32.totalorder %s1959_s26, 0 }
  0x77   : > { %939 = vmatpush1.bf16.msra.mxu0 %v938_v8  ;;  %v1068_v17 = vpack.c.bf16 %v259_v15, %v255_v14  ;;  %v256_v19 = vld [vmem:[%s1637_s17 + $0x60] sm:$0xff]  ;;  %v258_v22 = vld [vmem:[%s1637_s17 + $0x70] sm:$0xff]  ;;  %v261_v23 = vld [vmem:[%s1637_s17 + $0x88] sm:$0xff]  ;;  %s1431_s8 = smov [#allocation8]  }
  0x78   : > { %1067 = vmatpush1.bf16.msra.mxu1 %v1066_v12  ;;  %v942_v21 = vpack.c.bf16 %v256_v19, %v252_v18  ;;  %v265_v24 = vld [vmem:[%s1637_s17 + $0xa8] sm:$0xff]  ;;  %941 = vmatprep.subr.bf16.mxu0 %v940_v16  ;;  %v1070_v25 = vpack.c.bf16 %v258_v22, %v254_v20  ;;  %v263_v27 = vld [vmem:[%s1637_s17 + $0x98] sm:$0xff]  ;;  %v260_v29 = vld [vmem:[%s1637_s17 + $0x80] sm:$0xff]  ;;  %p1355_p13 = pnand %p1354_p9, %p1968_p12  ;;  %s1357_s29 = sshll.u32 %s1431_s8, 4  ;;  %s1358_s29 = int_to_ptr.vmem [resolvable:$false] %s1357_s29 }
  0x79   : > { %1069 = vmatprep.subr.bf16.mxu1 %v1068_v17  ;;  %v944_v26 = vpack.c.bf16 %v265_v24, %v261_v23  ;;  %v267_v28 = vld [vmem:[%s1637_s17 + $0xb8] sm:$0xff]  ;;  %v264_v31 = vld [vmem:[%s1637_s17 + $0xa0] sm:$0xff]  ;;  %v262_v32 = vld [vmem:[%s1637_s17 + $0x90] sm:$0xff]  ;;  %s1359_s30 = scalar_lea.vmem %s1358_s29, 1024  ;;  %p1360_p2 = scmp.lt.s32.totalorder %s1901_s21, %s1358_s29 }
  0x7a   : > { %v1072_v30 = vpack.c.bf16 %v267_v28, %v263_v27  ;;  %v266_v33 = vld [vmem:[%s1637_s17 + $0xb0] sm:$0xff]  ;;  %v946_v34 = vpack.c.bf16 %v264_v31, %v260_v29  ;;  %v269_v35 = vld [vmem:[%s1637_s17 + $0xc8] sm:$0xff]  ;;  %v271_v37 = vld [vmem:[%s1637_s17 + $0xd8] sm:$0xff]  ;;  %p1356_p6 = pneg %p1355_p13  ;;  %p1361_p0 = scmp.lt.s32.totalorder %s1359_s30, %s1353_s6 }
  0x7b   : > { %943 = vmatpush1.bf16.msra.mxu0 %v942_v21  ;;  %v273_v36 = vld [vmem:[%s1637_s17 + $0xe8] sm:$0xff]  ;;  %v1074_v38 = vpack.c.bf16 %v266_v33, %v262_v32  ;;  %v275_v40 = vld [vmem:[%s1637_s17 + $0xf8] sm:$0xff]  ;;  %v268_v41 = vld [vmem:[%s1637_s17 + $0xc0] sm:$0xff] }
  0x7c   : > { %1071 = vmatpush1.bf16.msra.mxu1 %v1070_v25  ;;  %945 = vmatprep.subr.bf16.mxu0 %v944_v26  ;;  %v948_v39 = vpack.c.bf16 %v273_v36, %v269_v35  ;;  %v272_v42 = vld [vmem:[%s1637_s17 + $0xe0] sm:$0xff]  ;;  %v1076_v43 = vpack.c.bf16 %v275_v40, %v271_v37  ;;  %v270_v44 = vld [vmem:[%s1637_s17 + $0xd0] sm:$0xff]  ;;  %v277_v46 = vld [vmem:[%s1637_s17 + $0x108] sm:$0xff]  ;;  %p1362_p3 = por %p1361_p0, %p1360_p2 }
  0x7d   : > { %1073 = vmatprep.subr.bf16.mxu1 %v1072_v30  ;;  %v274_v45 = vld [vmem:[%s1637_s17 + $0xf0] sm:$0xff]  ;;  %v281_v47 = vld [vmem:[%s1637_s17 + $0x128] sm:$0xff]  ;;  %v279_v48 = vld [vmem:[%s1637_s17 + $0x118] sm:$0xff]  ;;  %v950_v50 = vpack.c.bf16 %v272_v42, %v268_v41 }
  0x7e   : > { %v283_v49 = vld [vmem:[%s1637_s17 + $0x138] sm:$0xff]  ;;  %v1078_v51 = vpack.c.bf16 %v274_v45, %v270_v44  ;;  %v952_v52 = vpack.c.bf16 %v281_v47, %v277_v46  ;;  %v276_v53 = vld [vmem:[%s1637_s17 + $0x100] sm:$0xff]  ;;  %v278_v55 = vld [vmem:[%s1637_s17 + $0x110] sm:$0xff]  ;;  %p1363_p1 = pnand %p1362_p3, %p1356_p6 }
  0x7f   : > { %947 = vmatpush1.bf16.msra.mxu0 %v946_v34  ;;  %v280_v54 = vld [vmem:[%s1637_s17 + $0x120] sm:$0xff]  ;;  %v1080_v56 = vpack.c.bf16 %v283_v49, %v279_v48  ;;  %v282_v57 = vld [vmem:[%s1637_s17 + $0x130] sm:$0xff]  ;;  %v285_v58 = vld [vmem:[%s1637_s17 + $0x148] sm:$0xff] }
  0x80   : > { %1075 = vmatpush1.bf16.msra.mxu1 %v1074_v38  ;;  %949 = vmatprep.subr.bf16.mxu0 %v948_v39  ;;  %v289_v59 = vld [vmem:[%s1637_s17 + $0x168] sm:$0xff]  ;;  %v287_v60 = vld [vmem:[%s1637_s17 + $0x158] sm:$0xff]  ;;  %v954_v62 = vpack.c.bf16 %v280_v54, %v276_v53  ;;  %v1082_v63 = vpack.c.bf16 %v282_v57, %v278_v55  ;;  %v284_v1 = vld [vmem:[%s1637_s17 + $0x140] sm:$0xff] }
  0x81   : > { %1077 = vmatprep.subr.bf16.mxu1 %v1076_v43  ;;  %v291_v61 = vld [vmem:[%s1637_s17 + $0x178] sm:$0xff]  ;;  %v956_v0 = vpack.c.bf16 %v289_v59, %v285_v58  ;;  %v288_v2 = vld [vmem:[%s1637_s17 + $0x160] sm:$0xff]  ;;  %v286_v3 = vld [vmem:[%s1637_s17 + $0x150] sm:$0xff] }
  0x82   : > { %v1084_v4 = vpack.c.bf16 %v291_v61, %v287_v60  ;;  %v290_v5 = vld [vmem:[%s1637_s17 + $0x170] sm:$0xff]  ;;  %v293_v6 = vld [vmem:[%s1637_s17 + $0x188] sm:$0xff]  ;;  %v295_v8 = vld [vmem:[%s1637_s17 + $0x198] sm:$0xff]  ;;  %v958_v10 = vpack.c.bf16 %v288_v2, %v284_v1 }
  0x83   : > { %951 = vmatpush1.bf16.msra.mxu0 %v950_v50  ;;  %v297_v7 = vld [vmem:[%s1637_s17 + $0x1a8] sm:$0xff]  ;;  %v299_v9 = vld [vmem:[%s1637_s17 + $0x1b8] sm:$0xff]  ;;  %v1086_v11 = vpack.c.bf16 %v290_v5, %v286_v3  ;;  %v292_v13 = vld [vmem:[%s1637_s17 + $0x180] sm:$0xff] }
  0x84   : > { %1079 = vmatpush1.bf16.msra.mxu1 %v1078_v51  ;;  %953 = vmatprep.subr.bf16.mxu0 %v952_v52  ;;  %v960_v12 = vpack.c.bf16 %v297_v7, %v293_v6  ;;  %v296_v14 = vld [vmem:[%s1637_s17 + $0x1a0] sm:$0xff]  ;;  %v294_v15 = vld [vmem:[%s1637_s17 + $0x190] sm:$0xff]  ;;  %v1088_v16 = vpack.c.bf16 %v299_v9, %v295_v8  ;;  %v301_v18 = vld [vmem:[%s1637_s17 + $0x1c8] sm:$0xff] }
  0x85   : > { %1081 = vmatprep.subr.bf16.mxu1 %v1080_v56  ;;  %v298_v17 = vld [vmem:[%s1637_s17 + $0x1b0] sm:$0xff]  ;;  %v305_v19 = vld [vmem:[%s1637_s17 + $0x1e8] sm:$0xff]  ;;  %v303_v20 = vld [vmem:[%s1637_s17 + $0x1d8] sm:$0xff]  ;;  %v962_v22 = vpack.c.bf16 %v296_v14, %v292_v13 }
  0x86   : > { %v307_v21 = vld [vmem:[%s1637_s17 + $0x1f8] sm:$0xff]  ;;  %v1090_v23 = vpack.c.bf16 %v298_v17, %v294_v15  ;;  %v964_v24 = vpack.c.bf16 %v305_v19, %v301_v18  ;;  %v300_v25 = vld [vmem:[%s1637_s17 + $0x1c0] sm:$0xff]  ;;  %v302_v27 = vld [vmem:[%s1637_s17 + $0x1d0] sm:$0xff] }
  0x87   : > { %955 = vmatpush1.bf16.msra.mxu0 %v954_v62  ;;  %v304_v26 = vld [vmem:[%s1637_s17 + $0x1e0] sm:$0xff]  ;;  %v1092_v28 = vpack.c.bf16 %v307_v21, %v303_v20  ;;  %v306_v29 = vld [vmem:[%s1637_s17 + $0x1f0] sm:$0xff]  ;;  %v309_v30 = vld [vmem:[%s1637_s17 + $0x208] sm:$0xff] }
  0x88   : > { %1083 = vmatpush1.bf16.msra.mxu1 %v1082_v63  ;;  %957 = vmatprep.subr.bf16.mxu0 %v956_v0  ;;  %v313_v31 = vld [vmem:[%s1637_s17 + $0x228] sm:$0xff]  ;;  %v311_v32 = vld [vmem:[%s1637_s17 + $0x218] sm:$0xff]  ;;  %v966_v34 = vpack.c.bf16 %v304_v26, %v300_v25  ;;  %v1094_v35 = vpack.c.bf16 %v306_v29, %v302_v27  ;;  %v308_v37 = vld [vmem:[%s1637_s17 + $0x200] sm:$0xff] }
  0x89   : > { %1085 = vmatprep.subr.bf16.mxu1 %v1084_v4  ;;  %v315_v33 = vld [vmem:[%s1637_s17 + $0x238] sm:$0xff]  ;;  %v968_v36 = vpack.c.bf16 %v313_v31, %v309_v30  ;;  %v312_v38 = vld [vmem:[%s1637_s17 + $0x220] sm:$0xff]  ;;  %v310_v39 = vld [vmem:[%s1637_s17 + $0x210] sm:$0xff] }
  0x8a   : > { %v1096_v40 = vpack.c.bf16 %v315_v33, %v311_v32  ;;  %v314_v41 = vld [vmem:[%s1637_s17 + $0x230] sm:$0xff]  ;;  %v317_v42 = vld [vmem:[%s1637_s17 + $0x248] sm:$0xff]  ;;  %v319_v44 = vld [vmem:[%s1637_s17 + $0x258] sm:$0xff]  ;;  %v970_v46 = vpack.c.bf16 %v312_v38, %v308_v37 }
  0x8b   : > { %959 = vmatpush1.bf16.msra.mxu0 %v958_v10  ;;  %v321_v43 = vld [vmem:[%s1637_s17 + $0x268] sm:$0xff]  ;;  %v323_v45 = vld [vmem:[%s1637_s17 + $0x278] sm:$0xff]  ;;  %v1098_v47 = vpack.c.bf16 %v314_v41, %v310_v39  ;;  %v316_v49 = vld [vmem:[%s1637_s17 + $0x240] sm:$0xff] }
  0x8c   : > { %1087 = vmatpush1.bf16.msra.mxu1 %v1086_v11  ;;  %961 = vmatprep.subr.bf16.mxu0 %v960_v12  ;;  %v972_v48 = vpack.c.bf16 %v321_v43, %v317_v42  ;;  %v320_v50 = vld [vmem:[%s1637_s17 + $0x260] sm:$0xff]  ;;  %v318_v51 = vld [vmem:[%s1637_s17 + $0x250] sm:$0xff]  ;;  %v1100_v52 = vpack.c.bf16 %v323_v45, %v319_v44  ;;  %v325_v54 = vld [vmem:[%s1637_s17 + $0x288] sm:$0xff] }
  0x8d   : > { %1089 = vmatprep.subr.bf16.mxu1 %v1088_v16  ;;  %v322_v53 = vld [vmem:[%s1637_s17 + $0x270] sm:$0xff]  ;;  %v329_v55 = vld [vmem:[%s1637_s17 + $0x2a8] sm:$0xff]  ;;  %v327_v56 = vld [vmem:[%s1637_s17 + $0x298] sm:$0xff]  ;;  %v974_v58 = vpack.c.bf16 %v320_v50, %v316_v49 }
  0x8e   : > { %v331_v57 = vld [vmem:[%s1637_s17 + $0x2b8] sm:$0xff]  ;;  %v1102_v59 = vpack.c.bf16 %v322_v53, %v318_v51  ;;  %v976_v60 = vpack.c.bf16 %v329_v55, %v325_v54  ;;  %v324_v61 = vld [vmem:[%s1637_s17 + $0x280] sm:$0xff]  ;;  %v326_v63 = vld [vmem:[%s1637_s17 + $0x290] sm:$0xff] }
  0x8f   : > { %963 = vmatpush1.bf16.msra.mxu0 %v962_v22  ;;  %v328_v62 = vld [vmem:[%s1637_s17 + $0x2a0] sm:$0xff]  ;;  %v1104_v0 = vpack.c.bf16 %v331_v57, %v327_v56  ;;  %v330_v1 = vld [vmem:[%s1637_s17 + $0x2b0] sm:$0xff]  ;;  %v333_v2 = vld [vmem:[%s1637_s17 + $0x2c8] sm:$0xff] }
  0x90   : > { %1091 = vmatpush1.bf16.msra.mxu1 %v1090_v23  ;;  %965 = vmatprep.subr.bf16.mxu0 %v964_v24  ;;  %v337_v3 = vld [vmem:[%s1637_s17 + $0x2e8] sm:$0xff]  ;;  %v335_v4 = vld [vmem:[%s1637_s17 + $0x2d8] sm:$0xff]  ;;  %v978_v6 = vpack.c.bf16 %v328_v62, %v324_v61  ;;  %v332_v7 = vld [vmem:[%s1637_s17 + $0x2c0] sm:$0xff]  ;;  %v1106_v8 = vpack.c.bf16 %v330_v1, %v326_v63 }
  0x91   : > { %1093 = vmatprep.subr.bf16.mxu1 %v1092_v28  ;;  %v339_v5 = vld [vmem:[%s1637_s17 + $0x2f8] sm:$0xff]  ;;  %v980_v9 = vpack.c.bf16 %v337_v3, %v333_v2  ;;  %v336_v10 = vld [vmem:[%s1637_s17 + $0x2e0] sm:$0xff]  ;;  %v334_v11 = vld [vmem:[%s1637_s17 + $0x2d0] sm:$0xff] }
  0x92   : > { %v338_v12 = vld [vmem:[%s1637_s17 + $0x2f0] sm:$0xff]  ;;  %v1108_v13 = vpack.c.bf16 %v339_v5, %v335_v4  ;;  %v341_v14 = vld [vmem:[%s1637_s17 + $0x308] sm:$0xff]  ;;  %v343_v17 = vld [vmem:[%s1637_s17 + $0x318] sm:$0xff]  ;;  %v982_v19 = vpack.c.bf16 %v336_v10, %v332_v7 }
  0x93   : > { %967 = vmatpush1.bf16.msra.mxu0 %v966_v34  ;;  %v345_v15 = vld [vmem:[%s1637_s17 + $0x328] sm:$0xff]  ;;  %v347_v18 = vld [vmem:[%s1637_s17 + $0x338] sm:$0xff]  ;;  %v1110_v20 = vpack.c.bf16 %v338_v12, %v334_v11  ;;  %v340_v22 = vld [vmem:[%s1637_s17 + $0x300] sm:$0xff] }
  0x94   : > { %1095 = vmatpush1.bf16.msra.mxu1 %v1094_v35  ;;  %969 = vmatprep.subr.bf16.mxu0 %v968_v36  ;;  %v241_v16 = vld [vmem:[#allocation2 + $0x8] sm:$0xff]  ;;  %v984_v21 = vpack.c.bf16 %v345_v15, %v341_v14  ;;  %v344_v23 = vld [vmem:[%s1637_s17 + $0x320] sm:$0xff]  ;;  %v342_v24 = vld [vmem:[%s1637_s17 + $0x310] sm:$0xff]  ;;  %v1112_v25 = vpack.c.bf16 %v347_v18, %v343_v17 }
  0x95   : > { %1097 = vmatprep.subr.bf16.mxu1 %v1096_v40  ;;  %568 = vmatprep.mubr.f32.mxu0 %v241_v16  ;;  %v346_v26 = vld [vmem:[%s1637_s17 + $0x330] sm:$0xff]  ;;  %v349_v27 = vld [vmem:[%s1637_s17 + $0x348] sm:$0xff]  ;;  %v351_v29 = vld [vmem:[%s1637_s17 + $0x358] sm:$0xff]  ;;  %v986_v31 = vpack.c.bf16 %v344_v23, %v340_v22 }
  0x96   : > { %710 = vmatprep.mubr.f32.mxu1 %v241_v16  ;;  %v353_v28 = vld [vmem:[%s1637_s17 + $0x368] sm:$0xff]  ;;  %v355_v30 = vld [vmem:[%s1637_s17 + $0x378] sm:$0xff]  ;;  %v1114_v32 = vpack.c.bf16 %v346_v26, %v342_v24  ;;  %v348_v34 = vld [vmem:[%s1637_s17 + $0x340] sm:$0xff] }
  0x97   : > { %971 = vmatpush1.bf16.msra.mxu0 %v970_v46  ;;  %v988_v33 = vpack.c.bf16 %v353_v28, %v349_v27  ;;  %v352_v35 = vld [vmem:[%s1637_s17 + $0x360] sm:$0xff]  ;;  %v350_v36 = vld [vmem:[%s1637_s17 + $0x350] sm:$0xff]  ;;  %v1116_v37 = vpack.c.bf16 %v355_v30, %v351_v29  ;;  %v357_v39 = vld [vmem:[%s1637_s17 + $0x388] sm:$0xff] }
  0x98   : > { %1099 = vmatpush1.bf16.msra.mxu1 %v1098_v47  ;;  %973 = vmatprep.subr.bf16.mxu0 %v972_v48  ;;  %v354_v38 = vld [vmem:[%s1637_s17 + $0x370] sm:$0xff]  ;;  %v361_v40 = vld [vmem:[%s1637_s17 + $0x3a8] sm:$0xff]  ;;  %v359_v41 = vld [vmem:[%s1637_s17 + $0x398] sm:$0xff]  ;;  %v990_v43 = vpack.c.bf16 %v352_v35, %v348_v34 }
  0x99   : > { %1101 = vmatprep.subr.bf16.mxu1 %v1100_v52  ;;  %v363_v42 = vld [vmem:[%s1637_s17 + $0x3b8] sm:$0xff]  ;;  %v1118_v44 = vpack.c.bf16 %v354_v38, %v350_v36  ;;  %v992_v45 = vpack.c.bf16 %v361_v40, %v357_v39  ;;  %v356_v46 = vld [vmem:[%s1637_s17 + $0x380] sm:$0xff]  ;;  %v358_v48 = vld [vmem:[%s1637_s17 + $0x390] sm:$0xff] }
  0x9a   : > { %v360_v47 = vld [vmem:[%s1637_s17 + $0x3a0] sm:$0xff]  ;;  %v1120_v49 = vpack.c.bf16 %v363_v42, %v359_v41  ;;  %v362_v50 = vld [vmem:[%s1637_s17 + $0x3b0] sm:$0xff]  ;;  %v365_v51 = vld [vmem:[%s1637_s17 + $0x3c8] sm:$0xff] }
  0x9b   : > { %975 = vmatpush1.bf16.msra.mxu0 %v974_v58  ;;  %v369_v52 = vld [vmem:[%s1637_s17 + $0x3e8] sm:$0xff]  ;;  %v367_v53 = vld [vmem:[%s1637_s17 + $0x3d8] sm:$0xff]  ;;  %v994_v55 = vpack.c.bf16 %v360_v47, %v356_v46  ;;  %v1122_v56 = vpack.c.bf16 %v362_v50, %v358_v48  ;;  %v364_v58 = vld [vmem:[%s1637_s17 + $0x3c0] sm:$0xff] }
  0x9c   : > { %1103 = vmatpush1.bf16.msra.mxu1 %v1102_v59  ;;  %977 = vmatprep.subr.bf16.mxu0 %v976_v60  ;;  %v371_v54 = vld [vmem:[%s1637_s17 + $0x3f8] sm:$0xff]  ;;  %v996_v57 = vpack.c.bf16 %v369_v52, %v365_v51  ;;  %v368_v59 = vld [vmem:[%s1637_s17 + $0x3e0] sm:$0xff]  ;;  %v366_v60 = vld [vmem:[%s1637_s17 + $0x3d0] sm:$0xff] }
  0x9d   : > { %1105 = vmatprep.subr.bf16.mxu1 %v1104_v0  ;;  %v1124_v61 = vpack.c.bf16 %v371_v54, %v367_v53  ;;  %v370_v62 = vld [vmem:[%s1637_s17 + $0x3f0] sm:$0xff]  ;;  %v373_v63 = vld [vmem:[%s1637_s17 + $0x408] sm:$0xff]  ;;  %v375_v1 = vld [vmem:[%s1637_s17 + $0x418] sm:$0xff]  ;;  %v998_v3 = vpack.c.bf16 %v368_v59, %v364_v58 }
  0x9e   : > { %v377_v0 = vld [vmem:[%s1637_s17 + $0x428] sm:$0xff]  ;;  %v379_v2 = vld [vmem:[%s1637_s17 + $0x438] sm:$0xff]  ;;  %v1126_v4 = vpack.c.bf16 %v370_v62, %v366_v60  ;;  %v376_v7 = vld [vmem:[%s1637_s17 + $0x420] sm:$0xff] }
  0x9f   : > { %979 = vmatpush1.bf16.msra.mxu0 %v978_v6  ;;  %v1000_v5 = vpack.c.bf16 %v377_v0, %v373_v63  ;;  %v372_v6 = vld [vmem:[%s1637_s17 + $0x400] sm:$0xff]  ;;  %v378_v10 = vld [vmem:[%s1637_s17 + $0x430] sm:$0xff]  ;;  %v381_v11 = vld [vmem:[%s1637_s17 + $0x448] sm:$0xff] }
  0xa0   : > { %1107 = vmatpush1.bf16.msra.mxu1 %v1106_v8  ;;  %981 = vmatprep.subr.bf16.mxu0 %v980_v9  ;;  %v374_v8 = vld [vmem:[%s1637_s17 + $0x410] sm:$0xff]  ;;  %v1128_v9 = vpack.c.bf16 %v379_v2, %v375_v1  ;;  %v385_v12 = vld [vmem:[%s1637_s17 + $0x468] sm:$0xff]  ;;  %v387_v14 = vld [vmem:[%s1637_s17 + $0x478] sm:$0xff]  ;;  %v1002_v16 = vpack.c.bf16 %v376_v7, %v372_v6 }
  0xa1   : > { %1109 = vmatprep.subr.bf16.mxu1 %v1108_v13  ;;  %v383_v13 = vld [vmem:[%s1637_s17 + $0x458] sm:$0xff]  ;;  %v240_v15 = vld [vmem:[#allocation2] sm:$0xff]  ;;  %v1130_v17 = vpack.c.bf16 %v378_v10, %v374_v8  ;;  %v1004_v18 = vpack.c.bf16 %v385_v12, %v381_v11  ;;  %v386_v23 = vld [vmem:[%s1637_s17 + $0x470] sm:$0xff] }
  0xa2   : > { %v1132_v22 = vpack.c.bf16 %v387_v14, %v383_v13  ;;  %v389_v24 = vld [vmem:[%s1637_s17 + $0x488] sm:$0xff]  ;;  %v391_v26 = vld [vmem:[%s1637_s17 + $0x498] sm:$0xff]  ;;  %v394_v35 = vld [vmem:[%s1637_s17 + $0x4b0] sm:$0xff] }
  0xa3   : > { %983 = vmatpush1.bf16.msra.mxu0 %v982_v19  ;;  %v380_v19 = vld [vmem:[%s1637_s17 + $0x440] sm:$0xff]  ;;  %v395_v27 = vld [vmem:[%s1637_s17 + $0x4b8] sm:$0xff]  ;;  %v397_v36 = vld [vmem:[%s1637_s17 + $0x4c8] sm:$0xff] }
  0xa4   : > { %1111 = vmatpush1.bf16.msra.mxu1 %v1110_v20  ;;  %985 = vmatprep.subr.bf16.mxu0 %v984_v21  ;;  %v384_v20 = vld [vmem:[%s1637_s17 + $0x460] sm:$0xff]  ;;  %v382_v21 = vld [vmem:[%s1637_s17 + $0x450] sm:$0xff]  ;;  %v1136_v34 = vpack.c.bf16 %v395_v27, %v391_v26  ;;  %v399_v38 = vld [vmem:[%s1637_s17 + $0x4d8] sm:$0xff] }
  0xa5   : > { %1113 = vmatprep.subr.bf16.mxu1 %v1112_v25  ;;  %v393_v25 = vld [vmem:[%s1637_s17 + $0x4a8] sm:$0xff]  ;;  %v1006_v28 = vpack.c.bf16 %v384_v20, %v380_v19  ;;  %v1134_v29 = vpack.c.bf16 %v386_v23, %v382_v21  ;;  %v403_v39 = vld [vmem:[%s1637_s17 + $0x4f8] sm:$0xff]  ;;  %v402_v47 = vld [vmem:[%s1637_s17 + $0x4f0] sm:$0xff] }
  0xa6   : > { %v1008_v30 = vpack.c.bf16 %v393_v25, %v389_v24  ;;  %v1140_v46 = vpack.c.bf16 %v403_v39, %v399_v38  ;;  %v405_v48 = vld [vmem:[%s1637_s17 + $0x508] sm:$0xff]  ;;  %v407_v50 = vld [vmem:[%s1637_s17 + $0x518] sm:$0xff]  ;;  %v410_v59 = vld [vmem:[%s1637_s17 + $0x530] sm:$0xff] }
  0xa7   : > { %987 = vmatpush1.bf16.msra.mxu0 %v986_v31  ;;  %v388_v31 = vld [vmem:[%s1637_s17 + $0x480] sm:$0xff]  ;;  %v411_v51 = vld [vmem:[%s1637_s17 + $0x538] sm:$0xff]  ;;  %v413_v60 = vld [vmem:[%s1637_s17 + $0x548] sm:$0xff] }
  0xa8   : > { %1115 = vmatpush1.bf16.msra.mxu1 %v1114_v32  ;;  %989 = vmatprep.subr.bf16.mxu0 %v988_v33  ;;  %v392_v32 = vld [vmem:[%s1637_s17 + $0x4a0] sm:$0xff]  ;;  %v390_v33 = vld [vmem:[%s1637_s17 + $0x490] sm:$0xff]  ;;  %v1144_v58 = vpack.c.bf16 %v411_v51, %v407_v50  ;;  %v415_v62 = vld [vmem:[%s1637_s17 + $0x558] sm:$0xff] }
  0xa9   : > { %1117 = vmatprep.subr.bf16.mxu1 %v1116_v37  ;;  %v401_v37 = vld [vmem:[%s1637_s17 + $0x4e8] sm:$0xff]  ;;  %v1010_v40 = vpack.c.bf16 %v392_v32, %v388_v31  ;;  %v1138_v41 = vpack.c.bf16 %v394_v35, %v390_v33  ;;  %v419_v63 = vld [vmem:[%s1637_s17 + $0x578] sm:$0xff]  ;;  %v418_v7 = vld [vmem:[%s1637_s17 + $0x570] sm:$0xff] }
  0xaa   : > { %v1012_v42 = vpack.c.bf16 %v401_v37, %v397_v36  ;;  %v1148_v6 = vpack.c.bf16 %v419_v63, %v415_v62  ;;  %v421_v8 = vld [vmem:[%s1637_s17 + $0x588] sm:$0xff]  ;;  %v423_v10 = vld [vmem:[%s1637_s17 + $0x598] sm:$0xff]  ;;  %v420_v13 = vld [vmem:[%s1637_s17 + $0x580] sm:$0xff] }
  0xab   : > { %991 = vmatpush1.bf16.msra.mxu0 %v990_v43  ;;  %v396_v43 = vld [vmem:[%s1637_s17 + $0x4c0] sm:$0xff]  ;;  %v427_v11 = vld [vmem:[%s1637_s17 + $0x5b8] sm:$0xff]  ;;  %v429_v20 = vld [vmem:[%s1637_s17 + $0x5c8] sm:$0xff] }
  0xac   : > { %1119 = vmatpush1.bf16.msra.mxu1 %v1118_v44  ;;  %993 = vmatprep.subr.bf16.mxu0 %v992_v45  ;;  %v400_v44 = vld [vmem:[%s1637_s17 + $0x4e0] sm:$0xff]  ;;  %v398_v45 = vld [vmem:[%s1637_s17 + $0x4d0] sm:$0xff]  ;;  %v1152_v19 = vpack.c.bf16 %v427_v11, %v423_v10  ;;  %v433_v21 = vld [vmem:[%s1637_s17 + $0x5e8] sm:$0xff] }
  0xad   : > { %1121 = vmatprep.subr.bf16.mxu1 %v1120_v49  ;;  %v409_v49 = vld [vmem:[%s1637_s17 + $0x528] sm:$0xff]  ;;  %v1014_v52 = vpack.c.bf16 %v400_v44, %v396_v43  ;;  %v1142_v53 = vpack.c.bf16 %v402_v47, %v398_v45  ;;  %v431_v23 = vld [vmem:[%s1637_s17 + $0x5d8] sm:$0xff]  ;;  %v1028_v27 = vpack.c.bf16 %v433_v21, %v429_v20  ;;  %v434_v32 = vld [vmem:[%s1637_s17 + $0x5f0] sm:$0xff] }
  0xae   : > { %v1016_v54 = vpack.c.bf16 %v409_v49, %v405_v48  ;;  %v435_v24 = vld [vmem:[%s1637_s17 + $0x5f8] sm:$0xff]  ;;  %v437_v33 = vld [vmem:[%s1637_s17 + $0x608] sm:$0xff]  ;;  %v442_v44 = vld [vmem:[%s1637_s17 + $0x630] sm:$0xff] }
  0xaf   : > { %995 = vmatpush1.bf16.msra.mxu0 %v994_v55  ;;  %v404_v55 = vld [vmem:[%s1637_s17 + $0x500] sm:$0xff]  ;;  %v1156_v31 = vpack.c.bf16 %v435_v24, %v431_v23  ;;  %v439_v35 = vld [vmem:[%s1637_s17 + $0x618] sm:$0xff]  ;;  %v445_v45 = vld [vmem:[%s1637_s17 + $0x648] sm:$0xff] }
  0xb0   : > { %1123 = vmatpush1.bf16.msra.mxu1 %v1122_v56  ;;  %997 = vmatprep.subr.bf16.mxu0 %v996_v57  ;;  %v408_v56 = vld [vmem:[%s1637_s17 + $0x520] sm:$0xff]  ;;  %v406_v57 = vld [vmem:[%s1637_s17 + $0x510] sm:$0xff]  ;;  %v443_v36 = vld [vmem:[%s1637_s17 + $0x638] sm:$0xff] }
  0xb1   : > { %1125 = vmatprep.subr.bf16.mxu1 %v1124_v61  ;;  %v417_v61 = vld [vmem:[%s1637_s17 + $0x568] sm:$0xff]  ;;  %v1018_v0 = vpack.c.bf16 %v408_v56, %v404_v55  ;;  %v1146_v1 = vpack.c.bf16 %v410_v59, %v406_v57  ;;  %v1160_v43 = vpack.c.bf16 %v443_v36, %v439_v35  ;;  %v447_v47 = vld [vmem:[%s1637_s17 + $0x658] sm:$0xff]  ;;  %v450_v56 = vld [vmem:[%s1637_s17 + $0x670] sm:$0xff] }
  0xb2   : > { %v1020_v2 = vpack.c.bf16 %v417_v61, %v413_v60  ;;  %v451_v48 = vld [vmem:[%s1637_s17 + $0x678] sm:$0xff]  ;;  %v453_v57 = vld [vmem:[%s1637_s17 + $0x688] sm:$0xff]  ;;  %v468_v24 = vld [vmem:[%s1637_s17 + $0x700] sm:$0xff] }
  0xb3   : > { %999 = vmatpush1.bf16.msra.mxu0 %v998_v3  ;;  %v412_v3 = vld [vmem:[%s1637_s17 + $0x540] sm:$0xff]  ;;  %v1164_v55 = vpack.c.bf16 %v451_v48, %v447_v47  ;;  %v455_v59 = vld [vmem:[%s1637_s17 + $0x698] sm:$0xff] }
  0xb4   : > { %1127 = vmatpush1.bf16.msra.mxu1 %v1126_v4  ;;  %1001 = vmatprep.subr.bf16.mxu0 %v1000_v5  ;;  %v416_v4 = vld [vmem:[%s1637_s17 + $0x560] sm:$0xff]  ;;  %v414_v5 = vld [vmem:[%s1637_s17 + $0x550] sm:$0xff]  ;;  %v459_v60 = vld [vmem:[%s1637_s17 + $0x6b8] sm:$0xff] }
  0xb5   : > { %1129 = vmatprep.subr.bf16.mxu1 %v1128_v9  ;;  %v425_v9 = vld [vmem:[%s1637_s17 + $0x5a8] sm:$0xff]  ;;  %v1022_v12 = vpack.c.bf16 %v416_v4, %v412_v3  ;;  %v1150_v14 = vpack.c.bf16 %v418_v7, %v414_v5  ;;  %v1168_v3 = vpack.c.bf16 %v459_v60, %v455_v59  ;;  %v458_v4 = vld [vmem:[%s1637_s17 + $0x6b0] sm:$0xff]  ;;  %v463_v7 = vld [vmem:[%s1637_s17 + $0x6d8] sm:$0xff] }
  0xb6   : > { %569 = vmatmul.mubr.f32.vlgmr.msra.gmra.mrb[0].mxu0 %v240_v15  ;;  %v461_v5 = vld [vmem:[%s1637_s17 + $0x6c8] sm:$0xff]  ;;  %v475_v20 = vld [vmem:[%s1637_s17 + $0x738] sm:$0xff]  ;;  %v476_v36 = vld [vmem:[%s1637_s17 + $0x740] sm:$0xff] }
  0xb7   : > { %1003 = vmatpush1.bf16.msra.mxu0 %v1002_v16  ;;  %711 = vmatmul.mubr.f32.vlgmr.msra.gmra.mrb[0].mxu1 %v240_v15  ;;  %v1024_v15 = vpack.c.bf16 %v425_v9, %v421_v8  ;;  %v424_v16 = vld [vmem:[%s1637_s17 + $0x5a0] sm:$0xff]  ;;  %v467_v8 = vld [vmem:[%s1637_s17 + $0x6f8] sm:$0xff] }
  0xb8   : > { %1131 = vmatpush1.bf16.msra.mxu1 %v1130_v17  ;;  %1005 = vmatprep.subr.bf16.mxu0 %v1004_v18  ;;  %v422_v17 = vld [vmem:[%s1637_s17 + $0x590] sm:$0xff]  ;;  %v1026_v25 = vpack.c.bf16 %v424_v16, %v420_v13  ;;  %v464_v13 = vld [vmem:[%s1637_s17 + $0x6e0] sm:$0xff] }
  0xb9   : > { %1133 = vmatprep.subr.bf16.mxu1 %v1132_v22  ;;  %v426_v18 = vld [vmem:[%s1637_s17 + $0x5b0] sm:$0xff]  ;;  %v243_v22 = vld [vmem:[#allocation2 + $0x18] sm:$0xff]  ;;  %v484_v48 = vld [vmem:[%s1637_s17 + $0x780] sm:$0xff] }
  0xba   : > { %639 = vmatprep.mubr.f32.mxu0 %v243_v22  ;;  %781 = vmatprep.mubr.f32.mxu1 %v243_v22  ;;  %v1154_v26 = vpack.c.bf16 %v426_v18, %v422_v17  ;;  %v466_v16 = vld [vmem:[%s1637_s17 + $0x6f0] sm:$0xff]  ;;  %v469_v17 = vld [vmem:[%s1637_s17 + $0x708] sm:$0xff]  ;;  %v492_v60 = vld [vmem:[%s1637_s17 + $0x7c0] sm:$0xff] }
  0xbb   : > { %1007 = vmatpush1.bf16.msra.mxu0 %v1006_v28  ;;  %v428_v28 = vld [vmem:[%s1637_s17 + $0x5c0] sm:$0xff]  ;;  %v473_v18 = vld [vmem:[%s1637_s17 + $0x728] sm:$0xff] }
  0xbc   : > { %1135 = vmatpush1.bf16.msra.mxu1 %v1134_v29  ;;  %1009 = vmatprep.subr.bf16.mxu0 %v1008_v30  ;;  %v432_v29 = vld [vmem:[%s1637_s17 + $0x5e0] sm:$0xff]  ;;  %v430_v30 = vld [vmem:[%s1637_s17 + $0x5d0] sm:$0xff]  ;;  %v1048_v23 = vpack.c.bf16 %v473_v18, %v469_v17 }
  0xbd   : > { %1137 = vmatprep.subr.bf16.mxu1 %v1136_v34  ;;  %v441_v34 = vld [vmem:[%s1637_s17 + $0x628] sm:$0xff]  ;;  %v1030_v37 = vpack.c.bf16 %v432_v29, %v428_v28  ;;  %v1158_v38 = vpack.c.bf16 %v434_v32, %v430_v30  ;;  %v474_v28 = vld [vmem:[%s1637_s17 + $0x730] sm:$0xff]  ;;  %v483_v32 = vld [vmem:[%s1637_s17 + $0x778] sm:$0xff] }
  0xbe   : > { %v1032_v39 = vpack.c.bf16 %v441_v34, %v437_v33  ;;  %v477_v29 = vld [vmem:[%s1637_s17 + $0x748] sm:$0xff] }
  0xbf   : > { %1011 = vmatpush1.bf16.msra.mxu0 %v1010_v40  ;;  %v436_v40 = vld [vmem:[%s1637_s17 + $0x600] sm:$0xff]  ;;  %v481_v30 = vld [vmem:[%s1637_s17 + $0x768] sm:$0xff] }
  0xc0   : > { %1139 = vmatpush1.bf16.msra.mxu1 %v1138_v41  ;;  %1013 = vmatprep.subr.bf16.mxu0 %v1012_v42  ;;  %v440_v41 = vld [vmem:[%s1637_s17 + $0x620] sm:$0xff]  ;;  %v438_v42 = vld [vmem:[%s1637_s17 + $0x610] sm:$0xff]  ;;  %v1052_v35 = vpack.c.bf16 %v481_v30, %v477_v29 }
  0xc1   : > { %1141 = vmatprep.subr.bf16.mxu1 %v1140_v46  ;;  %v449_v46 = vld [vmem:[%s1637_s17 + $0x668] sm:$0xff]  ;;  %v1034_v49 = vpack.c.bf16 %v440_v41, %v436_v40  ;;  %v1162_v50 = vpack.c.bf16 %v442_v44, %v438_v42  ;;  %v482_v40 = vld [vmem:[%s1637_s17 + $0x770] sm:$0xff]  ;;  %v491_v44 = vld [vmem:[%s1637_s17 + $0x7b8] sm:$0xff] }
  0xc2   : > { %v1036_v51 = vpack.c.bf16 %v449_v46, %v445_v45  ;;  %v485_v41 = vld [vmem:[%s1637_s17 + $0x788] sm:$0xff] }
  0xc3   : > { %1015 = vmatpush1.bf16.msra.mxu0 %v1014_v52  ;;  %v444_v52 = vld [vmem:[%s1637_s17 + $0x640] sm:$0xff]  ;;  %v489_v42 = vld [vmem:[%s1637_s17 + $0x7a8] sm:$0xff] }
  0xc4   : > { %1143 = vmatpush1.bf16.msra.mxu1 %v1142_v53  ;;  %1017 = vmatprep.subr.bf16.mxu0 %v1016_v54  ;;  %v448_v53 = vld [vmem:[%s1637_s17 + $0x660] sm:$0xff]  ;;  %v446_v54 = vld [vmem:[%s1637_s17 + $0x650] sm:$0xff]  ;;  %v1056_v47 = vpack.c.bf16 %v489_v42, %v485_v41 }
  0xc5   : > { %1145 = vmatprep.subr.bf16.mxu1 %v1144_v58  ;;  %v457_v58 = vld [vmem:[%s1637_s17 + $0x6a8] sm:$0xff]  ;;  %v1038_v61 = vpack.c.bf16 %v448_v53, %v444_v52  ;;  %v1166_v62 = vpack.c.bf16 %v450_v56, %v446_v54  ;;  %v490_v52 = vld [vmem:[%s1637_s17 + $0x7b0] sm:$0xff]  ;;  %v499_v56 = vld [vmem:[%s1637_s17 + $0x7f8] sm:$0xff] }
  0xc6   : > { %v1040_v63 = vpack.c.bf16 %v457_v58, %v453_v57  ;;  %v493_v53 = vld [vmem:[%s1637_s17 + $0x7c8] sm:$0xff] }
  0xc7   : > { %1019 = vmatpush1.bf16.msra.mxu0 %v1018_v0  ;;  %v452_v0 = vld [vmem:[%s1637_s17 + $0x680] sm:$0xff]  ;;  %v497_v54 = vld [vmem:[%s1637_s17 + $0x7e8] sm:$0xff] }
  0xc8   : > { %1147 = vmatpush1.bf16.msra.mxu1 %v1146_v1  ;;  %1021 = vmatprep.subr.bf16.mxu0 %v1020_v2  ;;  %v456_v1 = vld [vmem:[%s1637_s17 + $0x6a0] sm:$0xff]  ;;  %v454_v2 = vld [vmem:[%s1637_s17 + $0x690] sm:$0xff]  ;;  %v1060_v59 = vpack.c.bf16 %v497_v54, %v493_v53 }
  0xc9   : > { %1149 = vmatprep.subr.bf16.mxu1 %v1148_v6  ;;  %v465_v6 = vld [vmem:[%s1637_s17 + $0x6e8] sm:$0xff]  ;;  %v1042_v9 = vpack.c.bf16 %v456_v1, %v452_v0  ;;  %v1170_v10 = vpack.c.bf16 %v458_v4, %v454_v2  ;;  %v498_v0 = vld [vmem:[%s1637_s17 + $0x7f0] sm:$0xff]  ;;  %v500_v4 = vld [vmem:[%s209_s5] sm:$0xff] }
  0xca   : > { %v1044_v11 = vpack.c.bf16 %v465_v6, %v461_v5  ;;  %v502_v5 = vld [vmem:[%s209_s5 + $0x10] sm:$0xff]  ;;  %v501_v6 = vld [vmem:[%s209_s5 + $0x8] sm:$0xff] }
  0xcb   : > { %1023 = vmatpush1.bf16.msra.mxu0 %v1022_v12  ;;  %v460_v12 = vld [vmem:[%s1637_s17 + $0x6c0] sm:$0xff] }
  0xcc   : > { %1151 = vmatpush1.bf16.msra.mxu1 %v1150_v14  ;;  %1025 = vmatprep.subr.bf16.mxu0 %v1024_v15  ;;  %v462_v14 = vld [vmem:[%s1637_s17 + $0x6d0] sm:$0xff]  ;;  %v1172_v15 = vpack.c.bf16 %v467_v8, %v463_v7  ;;  %v1046_v21 = vpack.c.bf16 %v464_v13, %v460_v12  ;;  %v503_v8 = vld [vmem:[%s209_s5 + $0x18] sm:$0xff] }
  0xcd   : > { %1153 = vmatprep.subr.bf16.mxu1 %v1152_v19  ;;  %v471_v19 = vld [vmem:[%s1637_s17 + $0x718] sm:$0xff]  ;;  %v1174_v22 = vpack.c.bf16 %v466_v16, %v462_v14 }
  0xcf   : > { %1027 = vmatpush1.bf16.msra.mxu0 %v1026_v25  ;;  %v472_v25 = vld [vmem:[%s1637_s17 + $0x720] sm:$0xff] }
  0xd0   : > { %1155 = vmatpush1.bf16.msra.mxu1 %v1154_v26  ;;  %1029 = vmatprep.subr.bf16.mxu0 %v1028_v27  ;;  %v470_v26 = vld [vmem:[%s1637_s17 + $0x710] sm:$0xff]  ;;  %v1176_v27 = vpack.c.bf16 %v475_v20, %v471_v19  ;;  %v1050_v33 = vpack.c.bf16 %v472_v25, %v468_v24 }
  0xd1   : > { %1157 = vmatprep.subr.bf16.mxu1 %v1156_v31  ;;  %v479_v31 = vld [vmem:[%s1637_s17 + $0x758] sm:$0xff]  ;;  %v1178_v34 = vpack.c.bf16 %v474_v28, %v470_v26 }
  0xd3   : > { %1031 = vmatpush1.bf16.msra.mxu0 %v1030_v37  ;;  %v480_v37 = vld [vmem:[%s1637_s17 + $0x760] sm:$0xff] }
  0xd4   : > { %1159 = vmatpush1.bf16.msra.mxu1 %v1158_v38  ;;  %1033 = vmatprep.subr.bf16.mxu0 %v1032_v39  ;;  %v478_v38 = vld [vmem:[%s1637_s17 + $0x750] sm:$0xff]  ;;  %v1180_v39 = vpack.c.bf16 %v483_v32, %v479_v31  ;;  %v1054_v45 = vpack.c.bf16 %v480_v37, %v476_v36 }
  0xd5   : > { %1161 = vmatprep.subr.bf16.mxu1 %v1160_v43  ;;  %v487_v43 = vld [vmem:[%s1637_s17 + $0x798] sm:$0xff]  ;;  %v1182_v46 = vpack.c.bf16 %v482_v40, %v478_v38 }
  0xd7   : > { %1035 = vmatpush1.bf16.msra.mxu0 %v1034_v49  ;;  %v488_v49 = vld [vmem:[%s1637_s17 + $0x7a0] sm:$0xff] }
  0xd8   : > { %1163 = vmatpush1.bf16.msra.mxu1 %v1162_v50  ;;  %1037 = vmatprep.subr.bf16.mxu0 %v1036_v51  ;;  %v486_v50 = vld [vmem:[%s1637_s17 + $0x790] sm:$0xff]  ;;  %v1184_v51 = vpack.c.bf16 %v491_v44, %v487_v43  ;;  %v1058_v57 = vpack.c.bf16 %v488_v49, %v484_v48 }
  0xd9   : > { %1165 = vmatprep.subr.bf16.mxu1 %v1164_v55  ;;  %v495_v55 = vld [vmem:[%s1637_s17 + $0x7d8] sm:$0xff]  ;;  %v1186_v58 = vpack.c.bf16 %v490_v52, %v486_v50 }
  0xdb   : > { %1039 = vmatpush1.bf16.msra.mxu0 %v1038_v61  ;;  %v496_v61 = vld [vmem:[%s1637_s17 + $0x7e0] sm:$0xff] }
  0xdc   : > { %1167 = vmatpush1.bf16.msra.mxu1 %v1166_v62  ;;  %1041 = vmatprep.subr.bf16.mxu0 %v1040_v63  ;;  %v1188_v62 = vpack.c.bf16 %v499_v56, %v495_v55  ;;  %v494_v63 = vld [vmem:[%s1637_s17 + $0x7d0] sm:$0xff]  ;;  %v1062_v1 = vpack.c.bf16 %v496_v61, %v492_v60 }
  0xdd   : > { %1169 = vmatprep.subr.bf16.mxu1 %v1168_v3  ;;  %v1190_v2 = vpack.c.bf16 %v498_v0, %v494_v63  ;;  %v242_v3 = vld [vmem:[#allocation2 + $0x10] sm:$0xff] }
  0xdf   : > { %1043 = vmatpush1.bf16.msra.mxu0 %v1042_v9 }
  0xe0   : > { %1171 = vmatpush1.bf16.msra.mxu1 %v1170_v10  ;;  %1045 = vmatprep.subr.bf16.mxu0 %v1044_v11 }
  0xe1   : > { %1173 = vmatprep.subr.bf16.mxu1 %v1172_v15 }
  0xe3   : > { %1047 = vmatpush1.bf16.msra.mxu0 %v1046_v21 }
  0xe4   : > { %1175 = vmatpush1.bf16.msra.mxu1 %v1174_v22  ;;  %1049 = vmatprep.subr.bf16.mxu0 %v1048_v23 }
  0xe5   : > { %1177 = vmatprep.subr.bf16.mxu1 %v1176_v27 }
  0xe7   : > { %1051 = vmatpush1.bf16.msra.mxu0 %v1050_v33 }
  0xe8   : > { %1179 = vmatpush1.bf16.msra.mxu1 %v1178_v34  ;;  %1053 = vmatprep.subr.bf16.mxu0 %v1052_v35 }
  0xe9   : > { %1181 = vmatprep.subr.bf16.mxu1 %v1180_v39 }
  0xeb   : > { %1055 = vmatpush1.bf16.msra.mxu0 %v1054_v45 }
  0xec   : > { %1183 = vmatpush1.bf16.msra.mxu1 %v1182_v46  ;;  %1057 = vmatprep.subr.bf16.mxu0 %v1056_v47 }
  0xed   : > { %1185 = vmatprep.subr.bf16.mxu1 %v1184_v51 }
  0xef   : > { %1059 = vmatpush1.bf16.msra.mxu0 %v1058_v57 }
  0xf0   : > { %1187 = vmatpush1.bf16.msra.mxu1 %v1186_v58  ;;  %1061 = vmatprep.subr.bf16.mxu0 %v1060_v59 }
  0xf1   : > { %1189 = vmatprep.subr.bf16.mxu1 %v1188_v62 }
  0xf3   : > { %1063 = vmatpush1.bf16.msra.mxu0 %v1062_v1 }
  0xf4   : > { %1191 = vmatpush1.bf16.msra.mxu1 %v1190_v2 }
  0xf6   : > { %640 = vmatmul.mubr.f32.vlgmr.msra.gmra.mrb[0].mxu0 %v242_v3 }
  0xf7   : > { %782 = vmatmul.mubr.f32.vlgmr.msra.gmra.mrb[0].mxu1 %v242_v3 }
 0x1c9   : > { %v641_v7 = vpop.f32.mrb[0].mxu0 }
 0x1ca   : > { %v1192_v9 = vadd.f32 %v641_v7, %v500_v4  ;;  %v783_v10 = vpop.f32.mrb[0].mxu1  ;;  %v643_v11 = vpop.f32.mrb[1].mxu0 }
 0x1cb   : > { %v1194_v12 = vadd.f32 %v783_v10, %v502_v5  ;;  %v1193_v13 = vadd.f32 %v643_v11, %v501_v6  ;;  %v785_v14 = vpop.f32.mrb[1].mxu1 }
 0x1cc   : > { %v788_v15 = vmax.f32 %v1192_v9, 0.0  ;;  %v1195_v16 = vadd.f32 %v785_v14, %v503_v8 }
 0x1cd   : > { %v790_v17 = vmax.f32 %v1194_v12, 0.0  ;;  %v789_v18 = vmax.f32 %v1193_v13, 0.0 }
 0x1ce   : > { %792 = vst [vmem:[%s236_s7] sm:$0xff] %v788_v15  ;;  %v791_v19 = vmax.f32 %v1195_v16, 0.0 }
 0x1cf   : > { %794 = vst [vmem:[%s236_s7 + $0x10] sm:$0xff] %v790_v17  ;;  %793 = vst [vmem:[%s236_s7 + $0x8] sm:$0xff] %v789_v18 }
 0x1d0   : > { %795 = vst [vmem:[%s236_s7 + $0x18] sm:$0xff] %v791_v19 }
 0x1d1   : > { %1366 = shalt.err (!%p1363_p1)
}
 0x1d2   : > { %s1367_s11 = scalar_lea.hbm %s1906_s27, 512  ;;  %s1371_s20 = scalar_lea.hbm %s1951_s3, 1024 }
 0x1d3   : > { %p1368_p4 = scmp.ne.s32.totalorder %s1906_s27, %s1367_s11  ;;  %p1372_p7 = scmp.lt.u32.totalorder %s1906_s27, %s1951_s3 }
 0x1d4   : > { %p1373_p5 = scmp.lt.u32.totalorder %s1371_s20, %s1367_s11  ;;  %p1375_p9 = scmp.lt.u32.totalorder %s1367_s11, %s1906_s27 }
 0x1d5   : > { %p1369_p11 = pnand %p1368_p4, %p1968_p12 }
 0x1d6   : > { %p1374_p10 = por %p1373_p5, %p1372_p7 }
 0x1d7   : > { %p1370_p8 = pneg %p1369_p11 }
 0x1d8   : > { %p1376_p13 = por %p1375_p9, %p1374_p10 }
 0x1da   : > { %p1377_p6 = pnand %p1376_p13, %p1370_p8 }
 0x1dc   : > { %1380 = shalt.err (!%p1377_p6)
}
 0x1dd   : > { %1208 = dma.vmem_to_hbm [thread:$0]  (%p1968_p12), %s1901_s21, 512, %s1906_s27, %s797_s25  }
 0x1de PF: > { %s823_s4 = sand.u32 1, %s1411_s12   ;;  %p1969_p2 = scmp.ne.s32.totalorder %s1960_s28, 0 }
 0x1df   : > { %p1970_p0 = scmp.ge.s32.totalorder %s1423_s15, 2  ;;  %s824_s5 = scalar_lea.sflag [#allocation4], %s823_s4 }
 0x1e1   : > { %p1222_p3 = pnand %p1970_p0, %p1969_p2 }
 0x1e3   : > { %1406 = dma.done.wait (!%p1222_p3), %s824_s5, 512  }
 0x1e4   : > { %1408 = vsyncadd (!%p1222_p3), %s824_s5, 4294966784  ;;  %p17_p1 = scmp.ge.s32.totalorder %s1473_s16, 4   ;;  %s1971_s12 = smov %s1415_s13 }
 0x1e5   : > { %s1972_s13 = smov %s1419_s14  ;;  %s1973_s14 = smov %s1484_s19 }
 0x1e6   : > { %s1974_s15 = smov %s1473_s16  ;;  %19 = sbr.rel (!%p17_p1) target bundleno = 6 (0x6), region = 93 }
 0x1ed   :  { %829 = vsyncpa [#allocation3], 1 }
 0x1ee   :  { %831 = vsyncpa [#allocation3 + $0x1], 1 }
 0x1ef   :  { %832 = vsyncpa [#allocation6], 1 }
 0x1f0   :  { %834 = vsyncpa [#allocation6 + $0x1], 1 }
 0x1f1   :  { %835 = vsyncpa [#allocation4], 1 }
 0x1f2   :  { %837 = vsyncpa [#allocation4 + $0x1], 1 }

</bundles_post_ra>
